<compile_context>
chip_gen: v7x
topology: tpu7x:2x2x1
jax: 0.10.0
libtpu: 0.0.40
codegen_flags: <defaults>
</compile_context>

<pallas_src>
import jax
import jax.numpy as jnp
from jax import lax
from jax.experimental import pallas as pl
from jax.experimental.pallas import tpu as pltpu

EPS = 1e-5


def _round_up(v, m):
    return ((v + m - 1) // m) * m


def _default_block_b():
    """Per-generation B-tile cap: keeps double-buffered in+out blocks inside
    the default scoped-VMEM limit (16 MiB v5e, 32 MiB v6e/v7x)."""
    try:
        kind = jax.devices()[0].device_kind.lower()
    except Exception:
        return 1024
    if any(tag in kind for tag in ("v6", "v7", "7x")):
        return 2048
    return 1024


# ----------------------------------------------------------------------------
# Kernels
# ----------------------------------------------------------------------------
def _ibn_fused_kernel(x_ref, gamma_ref, beta_ref, out_ref):
    """Whole-batch VMEM-resident kernel (small B). Two-pass statistics."""
    B, D = x_ref.shape
    half = D // 2

    # InstanceNorm half: per-row stats over the features.
    x1 = x_ref[:, :half].astype(jnp.float32)
    mean1 = jnp.sum(x1, axis=1, keepdims=True) * (1.0 / half)
    c1 = x1 - mean1
    var1 = jnp.sum(c1 * c1, axis=1, keepdims=True) * (1.0 / half)
    out_ref[:, :half] = (c1 * lax.rsqrt(var1 + EPS)).astype(out_ref.dtype)

    # BatchNorm half: per-feature stats over the batch, affine folded to one
    # mul + one add per element.
    x2 = x_ref[:, half:].astype(jnp.float32)
    mean2 = jnp.sum(x2, axis=0, keepdims=True) * (1.0 / B)
    c2 = x2 - mean2
    var2 = jnp.sum(c2 * c2, axis=0, keepdims=True) * (1.0 / B)
    scale2 = gamma_ref[...] * lax.rsqrt(var2 + EPS)
    out_ref[:, half:] = (c2 * scale2 + beta_ref[...]).astype(out_ref.dtype)


def _ibn_multi_kernel(x_ref, gamma_ref, beta_ref, out_ref):
    """K independent IBN applications ((K, B, D) stack) in one launch.
    BatchNorm statistics are per slice k (== K separate PyTorch IBN calls)."""
    K, B, D = x_ref.shape
    half = D // 2

    x1 = x_ref[:, :, :half].astype(jnp.float32)
    mean1 = jnp.sum(x1, axis=2, keepdims=True) * (1.0 / half)
    c1 = x1 - mean1
    var1 = jnp.sum(c1 * c1, axis=2, keepdims=True) * (1.0 / half)
    out_ref[:, :, :half] = (c1 * lax.rsqrt(var1 + EPS)).astype(out_ref.dtype)

    x2 = x_ref[:, :, half:].astype(jnp.float32)
    mean2 = jnp.sum(x2, axis=1, keepdims=True) * (1.0 / B)
    c2 = x2 - mean2
    var2 = jnp.sum(c2 * c2, axis=1, keepdims=True) * (1.0 / B)
    scale2 = gamma_ref[...] * lax.rsqrt(var2 + EPS)
    out_ref[:, :, half:] = (c2 * scale2 + beta_ref[...]).astype(out_ref.dtype)


def _make_bn_stats_kernel(total_b, block_b):
    """Tiled BatchNorm stats: per-tile two-pass variance + Chan combine across
    an 'arbitrary' B grid axis. Emits folded scale2/shift2 on the last step."""

    def kernel(x2_ref, gamma_ref, beta_ref, scale_ref, shift_ref,
               mean_acc, m2_acc):
        i = pl.program_id(0)

        @pl.when(i == 0)
        def _():
            mean_acc[...] = jnp.zeros_like(mean_acc)
            m2_acc[...] = jnp.zeros_like(m2_acc)

        x2 = x2_ref[...].astype(jnp.float32)                  # (block_b, half2)
        # Mask rows of a padded last tile (use where, not *, to kill NaN/Inf).
        row = lax.broadcasted_iota(jnp.int32, (block_b, 1), 0) + i * block_b
        valid = row < total_b
        n_tile = jnp.minimum(block_b, total_b - i * block_b).astype(jnp.float32)

        xv = jnp.where(valid, x2, 0.0)
        mean_tile = jnp.sum(xv, axis=0, keepdims=True) * (1.0 / n_tile)
        c = jnp.where(valid, x2 - mean_tile, 0.0)
        m2_tile = jnp.sum(c * c, axis=0, keepdims=True)

        # Chan parallel-variance combine with the running (mean, M2).
        n_prev = (i * block_b).astype(jnp.float32)
        n_new = n_prev + n_tile
        delta = mean_tile - mean_acc[...]
        mean_acc[...] = mean_acc[...] + delta * (n_tile / n_new)
        m2_acc[...] = m2_acc[...] + m2_tile + delta * delta * (n_prev * n_tile / n_new)

        @pl.when(i == pl.num_programs(0) - 1)
        def _():
            var2 = m2_acc[...] * (1.0 / total_b)               # biased (training BN)
            scale = gamma_ref[...] * lax.rsqrt(var2 + EPS)
            scale_ref[...] = scale
            shift_ref[...] = beta_ref[...] - mean_acc[...] * scale

    return kernel


def _ibn_apply_kernel(x_ref, scale2_ref, shift2_ref, out_ref):
    """Row-local kernel for the B-tiled path (BN scale/shift precomputed)."""
    _, D = x_ref.shape
    half = D // 2

    x1 = x_ref[:, :half].astype(jnp.float32)
    mean1 = jnp.sum(x1, axis=1, keepdims=True) * (1.0 / half)
    c1 = x1 - mean1
    var1 = jnp.sum(c1 * c1, axis=1, keepdims=True) * (1.0 / half)
    out_ref[:, :half] = (c1 * lax.rsqrt(var1 + EPS)).astype(out_ref.dtype)

    x2 = x_ref[:, half:].astype(jnp.float32)
    out_ref[:, half:] = (x2 * scale2_ref[...] + shift2_ref[...]).astype(out_ref.dtype)


# ----------------------------------------------------------------------------
# Wrappers
# ----------------------------------------------------------------------------
def ibn_forward(x, gamma, beta, *, block_b=None, small_b=128):
    """IBN forward. x: (B, D); gamma/beta: (D - D//2,) BatchNorm affine.

    B <= small_b : single whole-batch VMEM-resident call.
    B  > small_b : Pallas BN-stats pass (reads only the BN half, 'arbitrary'
                   accumulator grid) + B-tiled row-local apply pass
                   ('parallel' grid, double-buffered, lane-dense stores).
    """
    B, D = x.shape
    half = D // 2
    half2 = D - half
    gamma2 = gamma.reshape(1, half2).astype(jnp.float32)
    beta2 = beta.reshape(1, half2).astype(jnp.float32)

    if B <= small_b:
        return pl.pallas_call(
            _ibn_fused_kernel,
            out_shape=jax.ShapeDtypeStruct((B, D), x.dtype),
            in_specs=[
                pl.BlockSpec(memory_space=pltpu.MemorySpace.VMEM),
                pl.BlockSpec(memory_space=pltpu.MemorySpace.VMEM),
                pl.BlockSpec(memory_space=pltpu.MemorySpace.VMEM),
            ],
            out_specs=pl.BlockSpec(memory_space=pltpu.MemorySpace.VMEM),
        )(x, gamma2, beta2)

    assert D % 2 == 0, "tiled path assumes an even feature dim (768 in Model)"
    if block_b is None:
        block_b = _default_block_b()
    # Effective tile: big enough to amortize the ~0.35 us/step overhead, small
    # enough that mid-sized batches still get >= 2 pipelined steps.
    bb = min(_round_up(block_b, 8), max(128, _round_up(-(-B // 2), 8)))
    n_tiles = pl.cdiv(B, bb)

    # --- pass 1: BatchNorm scale/shift fully inside Pallas -------------------
    scale2, shift2 = pl.pallas_call(
        _make_bn_stats_kernel(B, bb),
        out_shape=(jax.ShapeDtypeStruct((1, half2), jnp.float32),
                   jax.ShapeDtypeStruct((1, half2), jnp.float32)),
        grid=(n_tiles,),
        in_specs=[
            # Feature-axis block index 1 * half2 == half: DMAs only the
            # BatchNorm half of x from HBM (no wrapper-side slice copy).
            pl.BlockSpec((bb, half2), lambda i: (i, 1)),
            pl.BlockSpec((1, half2), lambda i: (0, 0)),
            pl.BlockSpec((1, half2), lambda i: (0, 0)),
        ],
        out_specs=(pl.BlockSpec((1, half2), lambda i: (0, 0)),
                   pl.BlockSpec((1, half2), lambda i: (0, 0))),
        scratch_shapes=[pltpu.VMEM((1, half2), jnp.float32),
                        pltpu.VMEM((1, half2), jnp.float32)],
        compiler_params=pltpu.CompilerParams(
            dimension_semantics=("arbitrary",)),
    )(x, gamma2, beta2)

    # --- pass 2: row-local normalize, tiled over B ----------------------------
    return pl.pallas_call(
        _ibn_apply_kernel,
        out_shape=jax.ShapeDtypeStruct((B, D), x.dtype),
        grid=(n_tiles,),
        in_specs=[
            pl.BlockSpec((bb, D), lambda i: (i, 0)),
            pl.BlockSpec((1, half2), lambda i: (0, 0)),
            pl.BlockSpec((1, half2), lambda i: (0, 0)),
        ],
        out_specs=pl.BlockSpec((bb, D), lambda i: (i, 0)),
        compiler_params=pltpu.CompilerParams(
            dimension_semantics=("parallel",)),
    )(x, scale2, shift2)


def ibn_forward_multi(x_stack, gamma, beta):
    """Apply IBN independently to each of K stacked (B, D) tensors in ONE
    pallas_call (the Model's img/txt/fused (B, 768) globals). BatchNorm stats
    stay per slice, matching K separate nn.BatchNorm1d forward calls."""
    K, B, D = x_stack.shape
    half2 = D - D // 2
    return pl.pallas_call(
        _ibn_multi_kernel,
        out_shape=jax.ShapeDtypeStruct((K, B, D), x_stack.dtype),
        in_specs=[
            pl.BlockSpec(memory_space=pltpu.MemorySpace.VMEM),
            pl.BlockSpec(memory_space=pltpu.MemorySpace.VMEM),
            pl.BlockSpec(memory_space=pltpu.MemorySpace.VMEM),
        ],
        out_specs=pl.BlockSpec(memory_space=pltpu.MemorySpace.VMEM),
    )(x_stack, gamma.reshape(1, 1, half2).astype(jnp.float32),
      beta.reshape(1, 1, half2).astype(jnp.float32))


# ----------------------------------------------------------------------------
# Pure-JAX reference (matches PyTorch IBN, training-mode BN)
# ----------------------------------------------------------------------------
def ibn_reference(x, gamma, beta):
    D = x.shape[1]
    half = D // 2
    x1, x2 = x[:, :half], x[:, half:]
    m1 = x1.mean(axis=1, keepdims=True)
    v1 = ((x1 - m1) ** 2).mean(axis=1, keepdims=True)
    o1 = (x1 - m1) / jnp.sqrt(v1 + EPS)
    m2 = x2.mean(axis=0, keepdims=True)
    v2 = ((x2 - m2) ** 2).mean(axis=0, keepdims=True)
    o2 = (x2 - m2) / jnp.sqrt(v2 + EPS) * gamma[None, :] + beta[None, :]
    return jnp.concatenate([o1, o2], axis=1)


if __name__ == "__main__":
    key = jax.random.PRNGKey(0)
    D = 768
    half2 = D - D // 2
    k_x, k_g, k_b, k_x2, k_m = jax.random.split(key, 5)

    gamma = 1.0 + 0.1 * jax.random.normal(k_g, (half2,), dtype=jnp.float32)
    beta = 0.1 * jax.random.normal(k_b, (half2,), dtype=jnp.float32)

    # --- small-batch path: the Model's actual shape, (batch, 768) globals ----
    B = 8
    x = jax.random.normal(k_x, (B, D), dtype=jnp.float32) * 0.5 + 2.0
    out = jax.block_until_ready(ibn_forward(x, gamma, beta))
    ref = ibn_reference(x, gamma, beta)
    assert out.shape == (B, D)
    assert jnp.allclose(out, ref, atol=1e-4, rtol=1e-4), "small-path mismatch"

    # --- batched call sites: K IBN applications in one launch ----------------
    K = 3
    xs = jax.random.normal(k_m, (K, B, D), dtype=jnp.float32) + 1.0
    outs = jax.block_until_ready(ibn_forward_multi(xs, gamma, beta))
    refm = jnp.stack([ibn_reference(xs[k], gamma, beta) for k in range(K)])
    assert outs.shape == (K, B, D)
    assert jnp.allclose(outs, refm, atol=1e-4, rtol=1e-4), "multi-path mismatch"

    # --- tiled large-B path (small tile forced to exercise grid + row mask) --
    B2 = 60
    x_big = jax.random.normal(k_x2, (B2, D), dtype=jnp.float32) * 0.3 + 3.0
    out_big = jax.block_until_ready(
        ibn_forward(x_big, gamma, beta, block_b=16, small_b=8))
    ref_big = ibn_reference(x_big, gamma, beta)
    assert out_big.shape == (B2, D)
    assert jnp.allclose(out_big, ref_big, atol=1e-4, rtol=1e-4), "tiled mismatch"

    # --- bf16 I/O: dtype preserved at the boundary, f32 math inside ----------
    xb = (jax.random.normal(k_x2, (B, D), dtype=jnp.float32) + 1.0).astype(jnp.bfloat16)
    outb = jax.block_until_ready(ibn_forward(xb, gamma, beta))
    refb = ibn_reference(xb.astype(jnp.float32), gamma, beta)
    assert outb.dtype == jnp.bfloat16
    assert jnp.allclose(outb.astype(jnp.float32), refb, atol=3e-2, rtol=3e-2), \
        "bf16 mismatch"

    print("KERNEL_OK")
</pallas_src>

<mosaic_0001>
module attributes {stable_mosaic.version = 11 : i64} {
  func.func @_ibn_fused_kernel(%arg0: memref<8x768xf32, #tpu.memory_space<vmem>>, %arg1: memref<1x384xf32, #tpu.memory_space<vmem>>, %arg2: memref<1x384xf32, #tpu.memory_space<vmem>>, %arg3: memref<8x768xf32, #tpu.memory_space<vmem>>) attributes {dimension_semantics = [], scalar_prefetch = 0 : i64, scratch_operands = 0 : i64, tpu.core_type = #tpu.core_type<tc>} {
    %c0 = arith.constant 0 : index
    %c0_0 = arith.constant 0 : index
    %0 = vector.load %arg0[%c0, %c0_0] : memref<8x768xf32, #tpu.memory_space<vmem>>, vector<8x384xf32>
    %cst = arith.constant dense<0.000000e+00> : vector<8xf32>
    %1 = vector.multi_reduction <add>, %0, %cst [1] : vector<8x384xf32> to vector<8xf32>
    %2 = vector.shape_cast %1 : vector<8xf32> to vector<8x1xf32>
    %cst_1 = arith.constant 0.00260416674 : f32
    %3 = vector.broadcast %cst_1 : f32 to vector<8x1xf32>
    %4 = arith.mulf %2, %3 : vector<8x1xf32>
    %5 = vector.broadcast %4 : vector<8x1xf32> to vector<8x384xf32>
    %6 = arith.subf %0, %5 : vector<8x384xf32>
    %7 = arith.mulf %6, %6 : vector<8x384xf32>
    %cst_2 = arith.constant dense<0.000000e+00> : vector<8xf32>
    %8 = vector.multi_reduction <add>, %7, %cst_2 [1] : vector<8x384xf32> to vector<8xf32>
    %9 = vector.shape_cast %8 : vector<8xf32> to vector<8x1xf32>
    %cst_3 = arith.constant 0.00260416674 : f32
    %10 = vector.broadcast %cst_3 : f32 to vector<8x1xf32>
    %11 = arith.mulf %9, %10 : vector<8x1xf32>
    %cst_4 = arith.constant 9.99999974E-6 : f32
    %12 = vector.broadcast %cst_4 : f32 to vector<8x1xf32>
    %13 = arith.addf %11, %12 : vector<8x1xf32>
    %14 = math.rsqrt %13 : vector<8x1xf32>
    %15 = vector.broadcast %14 : vector<8x1xf32> to vector<8x384xf32>
    %16 = arith.mulf %6, %15 : vector<8x384xf32>
    %c0_5 = arith.constant 0 : index
    %c0_6 = arith.constant 0 : index
    %17 = vector.load %arg3[%c0_5, %c0_6] : memref<8x768xf32, #tpu.memory_space<vmem>>, vector<8x384xf32>
    tpu.vector_store %arg3[%c0_5, %c0_6], %16 {strides = array<i32>} : memref<8x768xf32, #tpu.memory_space<vmem>>, vector<8x384xf32>,
    %c0_7 = arith.constant 0 : index
    %c384 = arith.constant 384 : index
    %18 = vector.load %arg0[%c0_7, %c384] : memref<8x768xf32, #tpu.memory_space<vmem>>, vector<8x384xf32>
    %cst_8 = arith.constant dense<0.000000e+00> : vector<384xf32>
    %19 = vector.multi_reduction <add>, %18, %cst_8 [0] : vector<8x384xf32> to vector<384xf32>
    %20 = vector.shape_cast %19 : vector<384xf32> to vector<1x384xf32>
    %cst_9 = arith.constant 1.250000e-01 : f32
    %21 = vector.broadcast %cst_9 : f32 to vector<1x384xf32>
    %22 = arith.mulf %20, %21 : vector<1x384xf32>
    %23 = vector.broadcast %22 : vector<1x384xf32> to vector<8x384xf32>
    %24 = arith.subf %18, %23 : vector<8x384xf32>
    %25 = arith.mulf %24, %24 : vector<8x384xf32>
    %cst_10 = arith.constant dense<0.000000e+00> : vector<384xf32>
    %26 = vector.multi_reduction <add>, %25, %cst_10 [0] : vector<8x384xf32> to vector<384xf32>
    %27 = vector.shape_cast %26 : vector<384xf32> to vector<1x384xf32>
    %cst_11 = arith.constant 1.250000e-01 : f32
    %28 = vector.broadcast %cst_11 : f32 to vector<1x384xf32>
    %29 = arith.mulf %27, %28 : vector<1x384xf32>
    %c0_12 = arith.constant 0 : index
    %c0_13 = arith.constant 0 : index
    %30 = vector.load %arg1[%c0_12, %c0_13] : memref<1x384xf32, #tpu.memory_space<vmem>>, vector<1x384xf32>
    %cst_14 = arith.constant 9.99999974E-6 : f32
    %31 = vector.broadcast %cst_14 : f32 to vector<1x384xf32>
    %32 = arith.addf %29, %31 : vector<1x384xf32>
    %33 = math.rsqrt %32 : vector<1x384xf32>
    %34 = arith.mulf %30, %33 : vector<1x384xf32>
    %35 = vector.broadcast %34 : vector<1x384xf32> to vector<8x384xf32>
    %36 = arith.mulf %24, %35 : vector<8x384xf32>
    %c0_15 = arith.constant 0 : index
    %c0_16 = arith.constant 0 : index
    %37 = vector.load %arg2[%c0_15, %c0_16] : memref<1x384xf32, #tpu.memory_space<vmem>>, vector<1x384xf32>
    %38 = vector.broadcast %37 : vector<1x384xf32> to vector<8x384xf32>
    %39 = arith.addf %36, %38 : vector<8x384xf32>
    %c0_17 = arith.constant 0 : index
    %c384_18 = arith.constant 384 : index
    %40 = vector.load %arg3[%c0_17, %c384_18] : memref<8x768xf32, #tpu.memory_space<vmem>>, vector<8x384xf32>
    tpu.vector_store %arg3[%c0_17, %c384_18], %39 {strides = array<i32>} : memref<8x768xf32, #tpu.memory_space<vmem>>, vector<8x384xf32>,
    return
  }
}

</mosaic_0001>

<bundles_post_ra>
// kernel: tpu_custom_call.1
= control target key start
LH: loop header
LB: loop body
LE: loop exit
PB: predicated region body
PF: predicated region fallthrough
CT: control target
= control target key end

     0   :  { %8 = vsyncpa [#allocation3], 0  ;;  %s339_s0 = inlined_call_operand.hbm [shape: f32[8,768], index: 0, kind: input, shape index: {}]   ;;  %s340_s1 = inlined_call_operand.vmem [shape: f32[1,384], index: 1, kind: input, shape index: {}]   ;;  %s341_s2 = inlined_call_operand.vmem [shape: f32[1,384], index: 2, kind: input, shape index: {}]   ;;  %s342_s3 = inlined_call_operand.hbm [shape: f32[8,768], index: 3, kind: output, shape index: {}]  }
   0x1   :  { %9 = vsyncpa [#allocation4], 0  ;;  %s256_s12 = smov [#allocation2]   ;;  %s208_s16 = scalar_lea.hbm %s339_s0, 768 }
   0x2   :  { %s16_s13 = sshll.u32 %s256_s12, 4  ;;  %p209_p0 = scmp.ne.s32.totalorder %s339_s0, %s208_s16  ;;  %s17_s13 = int_to_ptr.vmem [resolvable:$true] %s16_s13 }
   0x3   :  { %p212_p1 = scmp.lt.u32.totalorder %s208_s16, %s339_s0 }
   0x5   :  { %p214_p2 = pnand %p212_p1, %p209_p0 }
   0x7   :  { %217 = shalt.err (!%p214_p2)
}
   0x8   :  { %s218_s21 = scalar_lea.vmem %s17_s13, 768  ;;  %p223_p4 = scmp.lt.s32.totalorder %s17_s13, %s17_s13 }
   0x9   :  { %p219_p3 = scmp.ne.s32.totalorder %s17_s13, %s218_s21  ;;  %p224_p5 = scmp.lt.s32.totalorder %s218_s21, %s218_s21 }
   0xb   :  { %p225_p6 = por %p224_p5, %p223_p4 }
   0xd   :  { %p226_p7 = pnand %p225_p6, %p219_p3 }
   0xf   :  { %229 = shalt.err (!%p226_p7)
}
  0x10   :  { %19 = dma.hbm_to_vmem [thread:$0]  %s339_s0, 768, %s17_s13, [#allocation3]  }
  0x11   :  { %252 = dma.done.wait [#allocation3], 768  }
  0x12   :  { %253 = vsyncadd [#allocation3], 4294966528  ;;  %v27_v0 = vld [vmem:[#allocation2] sm:$0xff]  ;;  %v28_v1 = vld [vmem:[#allocation2 + $0x8] sm:$0xff] }
  0x13   :  { %v29_v2 = vld [vmem:[#allocation2 + $0x10] sm:$0xff]  ;;  %v30_v3 = vadd.f32 %v28_v1, %v27_v0  ;;  %v54_v5 = vld [vmem:[#allocation2 + $0x18] sm:$0xff]  ;;  %v55_v6 = vld [vmem:[#allocation2 + $0x20] sm:$0xff] }
  0x14   :  { %v57_v7 = vrot.slane %v54_v5, 4  ;;  %v63_v8 = vrot.slane %v55_v6, 4  ;;  %v56_v9 = vld [vmem:[#allocation2 + $0x28] sm:$0xff] }
  0x15   :  { %v31_v4 = vadd.f32 %v30_v3, %v29_v2  ;;  %v69_v12 = vrot.slane %v56_v9, 4 }
  0x16   :  { %v58_v10 = vadd.f32 %v57_v7, %v54_v5  ;;  %v64_v11 = vadd.f32 %v63_v8, %v55_v6  ;;  %v119_v7 = vlaneseq }
  0x17   :  { %32 = vadd.xlane.f32.xlu0 %v31_v4  ;;  %v70_v15 = vadd.f32 %v69_v12, %v56_v9 }
  0x18   :  { %v59_v13 = vrot.slane %v58_v10, 2  ;;  %v65_v14 = vrot.slane %v64_v11, 2 }
  0x19   :  { %v71_v18 = vrot.slane %v70_v15, 2 }
  0x1a   :  { %v60_v16 = vadd.f32 %v59_v13, %v58_v10  ;;  %v66_v17 = vadd.f32 %v65_v14, %v64_v11 }
  0x1b   :  { %v72_v21 = vadd.f32 %v71_v18, %v70_v15  ;;  %v105_v18 = vld [vmem:[%s340_s1] sm:$0x7]  ;;  %s258_s1 = smov [#allocation5]  }
  0x1c   :  { %v61_v19 = vrot.slane %v60_v16, 1  ;;  %v67_v20 = vrot.slane %v66_v17, 1 }
  0x1d   :  { %v73_v24 = vrot.slane %v72_v21, 1 }
  0x1e   :  { %v62_v22 = vadd.f32 %v61_v19, %v60_v16  ;;  %v68_v23 = vadd.f32 %v67_v20, %v66_v17 }
  0x1f   :  { %v74_v25 = vadd.f32 %v73_v24, %v72_v21 }
  0x20   :  { %v75_v26 = vmul.f32 0.125, %v62_v22  ;;  %v76_v27 = vmul.f32 0.125, %v68_v23 }
  0x21   :  { %v77_v28 = vmul.f32 0.125, %v74_v25 }
  0x22   :  { %v291_v29 = vsub.f32 %v54_v5, %v75_v26  ;;  %v293_v30 = vsub.f32 %v55_v6, %v76_v27  ;;  %v257_v5 = vmov 1966171168   ;;  %v159_v27 = vld [vmem:[%s341_s2] sm:$0x7]  ;;  %s188_s2 = sshll.u32 %s258_s1, 4  ;;  %s189_s2 = int_to_ptr.vmem [resolvable:$true] %s188_s2 }
  0x23   :  { %v295_v31 = vsub.f32 %v56_v9, %v77_v28  ;;  %v117_v6 = vunpack.c.l.s4 %v257_v5  ;;  %v120_v9 = vshrl.u32 %v119_v7, 7  ;;  %s230_s27 = scalar_lea.vmem %s189_s2, 768  ;;  %p235_p9 = scmp.lt.s32.totalorder %s189_s2, %s189_s2 }
  0x24   :  { %v81_v32 = vmul.f32 %v291_v29, %v291_v29  ;;  %v82_v33 = vmul.f32 %v293_v30, %v293_v30  ;;  %p231_p8 = scmp.ne.s32.totalorder %s189_s2, %s230_s27  ;;  %p236_p10 = scmp.lt.s32.totalorder %s230_s27, %s230_s27 }
  0x25   :  { %v83_v34 = vmul.f32 %v295_v31, %v295_v31  ;;  %v118_v8 = vunpack.c.0.s8 %v117_v6  ;;  %v143_v20 = vsub.s32 0, %v120_v9  ;;  %v147_v21 = vsub.s32 1, %v120_v9 }
  0x26   :  { %v84_v35 = vrot.slane %v81_v32, 4  ;;  %v90_v36 = vrot.slane %v82_v33, 4  ;;  %v151_v22 = vsub.s32 2, %v120_v9  ;;  %p237_p11 = por %p236_p10, %p235_p9 }
  0x27   :  { %v96_v41 = vrot.slane %v83_v34, 4  ;;  %v121_v12 = vsub.s32 %v118_v8, %v120_v9  ;;  %v164_v28 = vrot.slane %v159_v27, %v143_v20 }
  0x28   :  { %v85_v39 = vadd.f32 %v84_v35, %v81_v32  ;;  %v91_v40 = vadd.f32 %v90_v36, %v82_v33  ;;  %v168_v32 = vrot.slane %v159_v27, %v147_v21  ;;  %v172_v33 = vrot.slane %v159_v27, %v151_v22  ;;  %p238_p12 = pnand %p237_p11, %p231_p8 }
  0x29   :  { %v97_v47 = vadd.f32 %v96_v41, %v83_v34 }
  0x2a   :  { %v86_v45 = vrot.slane %v85_v39, 2  ;;  %v92_v46 = vrot.slane %v91_v40, 2 }
  0x2b   :  { %v98_v52 = vrot.slane %v97_v47, 2 }
  0x2c   :  { %v87_v50 = vadd.f32 %v86_v45, %v85_v39  ;;  %v93_v51 = vadd.f32 %v92_v46, %v91_v40 }
  0x2d   :  { %v99_v57 = vadd.f32 %v98_v52, %v97_v47 }
  0x2e   :  { %v88_v55 = vrot.slane %v87_v50, 1  ;;  %v94_v56 = vrot.slane %v93_v51, 1 }
  0x2f   :  { %v100_v61 = vrot.slane %v99_v57, 1 }
  0x30   :  { %v89_v59 = vadd.f32 %v88_v55, %v87_v50  ;;  %v95_v60 = vadd.f32 %v94_v56, %v93_v51 }
  0x31   :  { %v101_v63 = vadd.f32 %v100_v61, %v99_v57 }
  0x32   :  { %v102_v62 = vmul.f32 0.125, %v89_v59 }
  0xa4   :  { %v33_v37 = vpop.xlane.xlu0 %32 }
  0xa5   :  { %v34_v38 = vmul.f32 0.0026041667, %v33_v37 }
  0xa7   :  { %v303_v42 = vsub.f32 %v27_v0, %v34_v38  ;;  %v305_v43 = vsub.f32 %v28_v1, %v34_v38  ;;  %v307_v44 = vsub.f32 %v29_v2, %v34_v38  ;;  %v103_v0 = vmul.f32 0.125, %v95_v60 }
  0xa8   :  { %v106_v1 = vadd.f32 1e-05, %v102_v62  ;;  %v104_v2 = vmul.f32 0.125, %v101_v63 }
  0xa9   :  { %v38_v48 = vmul.f32 %v303_v42, %v303_v42  ;;  %v39_v49 = vmul.f32 %v305_v43, %v305_v43  ;;  %v40_v53 = vmul.f32 %v307_v44, %v307_v44  ;;  %v107_v3 = vadd.f32 1e-05, %v103_v0 }
  0xaa   :  { %200 = vrsqrt.f32 %v106_v1  ;;  %v108_v4 = vadd.f32 1e-05, %v104_v2 }
  0xab   :  { %v41_v54 = vadd.f32 %v39_v49, %v38_v48  ;;  %202 = vrsqrt.f32 %v107_v3 }
  0xac   :  { %204 = vrsqrt.f32 %v108_v4 }
  0xad   :  { %v42_v58 = vadd.f32 %v41_v54, %v40_v53 }
  0xaf   :  { %43 = vadd.xlane.f32.xlu0 %v42_v58 }
  0xb4   :  { %v201_v10 = vpop.eup %200 }
  0xb5   :  { %v203_v11 = vpop.eup %202 }
  0xb6   :  { %v115_v13 = vcombine.low %v201_v10, %v203_v11  ;;  %v205_v14 = vpop.eup %204 }
  0xb7   :  { %v129_v16 = vrot.slane %v205_v14, %v121_v12 }
  0xb8   :  { %v122_v15 = vrot.slane %v115_v13, %v121_v12 }
  0xba   :  { %v130_v17 = vcombine.low %v122_v15, %v129_v16 }
  0xbc   :  { %v137_v19 = vrot.slane %v130_v17, %v121_v12 }
  0xbe   :  { %v139_v23 = vmul.f32 %v137_v19, %v105_v18 }
  0xc0   :  { %v144_v24 = vrot.slane %v139_v23, %v143_v20  ;;  %v148_v25 = vrot.slane %v139_v23, %v147_v21  ;;  %v152_v26 = vrot.slane %v139_v23, %v151_v22 }
  0xc2   :  { %v156_v34 = vmul.f32 %v144_v24, %v291_v29  ;;  %v157_v35 = vmul.f32 %v148_v25, %v293_v30  ;;  %v158_v36 = vmul.f32 %v152_v26, %v295_v31 }
  0xc4   :  { %v176_v37 = vadd.f32 %v164_v28, %v156_v34  ;;  %v177_v38 = vadd.f32 %v168_v32, %v157_v35  ;;  %v178_v39 = vadd.f32 %v172_v33, %v158_v36 }
  0xc6   :  { %179 = vst [vmem:[#allocation5 + $0x18] sm:$0xff] %v176_v37  ;;  %180 = vst [vmem:[#allocation5 + $0x20] sm:$0xff] %v177_v38 }
  0xc7   :  { %181 = vst [vmem:[#allocation5 + $0x28] sm:$0xff] %v178_v39 }
 0x13c   :  { %v44_v40 = vpop.xlane.xlu0 %43 }
 0x13d   :  { %v45_v41 = vmul.f32 0.0026041667, %v44_v40 }
 0x13f   :  { %v46_v45 = vadd.f32 1e-05, %v45_v41 }
 0x141   :  { %206 = vrsqrt.f32 %v46_v45 }
 0x14b   :  { %v207_v46 = vpop.eup %206 }
 0x14c   :  { %v48_v47 = vmul.f32 %v207_v46, %v303_v42  ;;  %v49_v29 = vmul.f32 %v207_v46, %v305_v43  ;;  %v50_v30 = vmul.f32 %v207_v46, %v307_v44 }
 0x14e   :  { %51 = vst [vmem:[#allocation5] sm:$0xff] %v48_v47  ;;  %52 = vst [vmem:[#allocation5 + $0x8] sm:$0xff] %v49_v29 }
 0x14f   :  { %53 = vst [vmem:[#allocation5 + $0x10] sm:$0xff] %v50_v30 }
 0x150   :  { %241 = shalt.err (!%p238_p12)
}
 0x151   :  { %s242_s30 = scalar_lea.hbm %s342_s3, 768 }
 0x152   :  { %p243_p13 = scmp.ne.s32.totalorder %s342_s3, %s242_s30  ;;  %p246_p0 = scmp.lt.u32.totalorder %s242_s30, %s342_s3 }
 0x154   :  { %p248_p1 = pnand %p246_p0, %p243_p13 }
 0x156   :  { %251 = shalt.err (!%p248_p1)
}
 0x157   :  { %191 = dma.vmem_to_hbm [thread:$0]  %s189_s2, 768, %s342_s3, [#allocation4]  }
 0x158   :  { %254 = dma.done.wait [#allocation4], 768  }
 0x159   :  { %255 = vsyncadd [#allocation4], 4294966528 }
 0x15a   :  { %195 = vsyncpa [#allocation3], 1 }
 0x15b   :  { %196 = vsyncpa [#allocation4], 1 }

</bundles_post_ra>
